<compile_context>
chip_gen: v7x
topology: tpu7x:2x2x1
jax: 0.10.0
libtpu: 0.0.40
codegen_flags: <defaults>
</compile_context>

<pallas_src>
import jax
import jax.numpy as jnp
from jax.experimental import pallas as pl
from jax.experimental.pallas import tpu as pltpu

_LANE = 128
_SUBLANE = 8


def _fixed_tau_kernel(dt_ref, tau_ref, decay_ref):
    # decay = exp(-dt / tau) — elementwise (VPU divide + EUP exp).
    dt = dt_ref[0]
    decay_ref[...] = jnp.exp(-dt / tau_ref[...])


def fixed_tau_decay(tau: jax.Array, dt: float, *, block_rows: int = 4096) -> jax.Array:
    """Compute exp(-dt / tau) with a Pallas TPU kernel.

    tau: (in_features,) float32
    returns: (in_features,) float32
    """
    n = tau.shape[0]
    assert block_rows % _SUBLANE == 0, "block_rows must be a multiple of 8"

    # Pad to a multiple of 8*128 so the (rows, 128) layout is vreg-aligned.
    chunk = _LANE * _SUBLANE
    padded = ((n + chunk - 1) // chunk) * chunk
    if padded != n:
        # Pad with 1.0 so the discarded lanes never divide by zero.
        tau_p = jnp.pad(tau, (0, padded - n), constant_values=1.0)
    else:
        tau_p = tau
    rows = padded // _LANE
    tau2d = tau_p.reshape(rows, _LANE)

    # dt as an SMEM scalar so the kernel does not bake in the value.
    dt_arr = jnp.asarray([dt], dtype=tau.dtype)

    if rows <= block_rows:
        # Single block, no grid: whole array lives in VMEM for the one call.
        out = pl.pallas_call(
            _fixed_tau_kernel,
            out_shape=jax.ShapeDtypeStruct((rows, _LANE), tau.dtype),
            in_specs=[
                pl.BlockSpec(memory_space=pltpu.MemorySpace.SMEM),
                pl.BlockSpec(memory_space=pltpu.MemorySpace.VMEM),
            ],
            out_specs=pl.BlockSpec(memory_space=pltpu.MemorySpace.VMEM),
        )(dt_arr, tau2d)
    else:
        # Row-tiled, double-buffered, parallel across TensorCores.
        grid = (pl.cdiv(rows, block_rows),)
        out = pl.pallas_call(
            _fixed_tau_kernel,
            out_shape=jax.ShapeDtypeStruct((rows, _LANE), tau.dtype),
            grid=grid,
            in_specs=[
                pl.BlockSpec(memory_space=pltpu.MemorySpace.SMEM),
                pl.BlockSpec((block_rows, _LANE), lambda i: (i, 0)),
            ],
            out_specs=pl.BlockSpec((block_rows, _LANE), lambda i: (i, 0)),
            compiler_params=pltpu.CompilerParams(
                dimension_semantics=("parallel",)
            ),
        )(dt_arr, tau2d)

    return out.reshape(padded)[:n]


class FixedTau:
    """JAX/Pallas port of the PyTorch FixedTau module (forward pass)."""

    def __init__(self, in_features: int, dt: float, tau_min: float,
                 tau_max: float, key: jax.Array):
        self.in_features = in_features
        self.dt = float(dt)
        self.tau_min = float(tau_min)
        self.tau_max = float(tau_max)
        # reset_parameters(): uniform_(weight, a=tau_min, b=tau_max)
        self.weight = jax.random.uniform(
            key, (in_features,), dtype=jnp.float32,
            minval=tau_min, maxval=tau_max)

    def apply_parameter_constraints(self):
        pass  # FixedTau: no constraints

    def get_tau(self) -> jax.Array:
        return self.weight

    def forward(self) -> jax.Array:
        return fixed_tau_decay(self.get_tau(), self.dt)

    def get_decay(self) -> jax.Array:
        return self.forward()


if __name__ == "__main__":
    key = jax.random.PRNGKey(0)
    dt = 1.0
    tau_min = 5.0
    tau_max = 25.0

    # Small case (matches the module's typical hidden size): single-block path.
    in_features = 32
    module = FixedTau(in_features, dt, tau_min, tau_max, key)
    decay = jax.block_until_ready(module.forward())
    ref = jnp.exp(-dt / module.weight)
    assert decay.shape == (in_features,)
    assert jnp.allclose(decay, ref, rtol=1e-6, atol=1e-6), (decay, ref)

    # Non-multiple-of-128 size + forced small block_rows to exercise the
    # tiled (grid) path with padding/slicing, still at a small shape.
    key2 = jax.random.PRNGKey(1)
    n2 = 5000
    tau2 = jax.random.uniform(key2, (n2,), dtype=jnp.float32,
                              minval=tau_min, maxval=tau_max)
    decay2 = jax.block_until_ready(fixed_tau_decay(tau2, dt, block_rows=8))
    ref2 = jnp.exp(-dt / tau2)
    assert decay2.shape == (n2,)
    assert jnp.allclose(decay2, ref2, rtol=1e-6, atol=1e-6)

    print("KERNEL_OK")
</pallas_src>

<mosaic_0001>
module attributes {stable_mosaic.version = 11 : i64} {
  func.func @_fixed_tau_kernel(%arg0: memref<1xf32, #tpu.memory_space<smem>>, %arg1: memref<8x128xf32, #tpu.memory_space<vmem>>, %arg2: memref<8x128xf32, #tpu.memory_space<vmem>>) attributes {dimension_semantics = [], scalar_prefetch = 0 : i64, scratch_operands = 0 : i64, tpu.core_type = #tpu.core_type<tc>} {
    %c0 = arith.constant 0 : index
    %0 = memref.load %arg0[%c0] : memref<1xf32, #tpu.memory_space<smem>>
    %cst = arith.constant 0.000000e+00 : f32
    %1 = arith.subf %cst, %0 : f32
    %c0_0 = arith.constant 0 : index
    %c0_1 = arith.constant 0 : index
    %2 = vector.load %arg1[%c0_0, %c0_1] : memref<8x128xf32, #tpu.memory_space<vmem>>, vector<8x128xf32>
    %3 = vector.broadcast %1 : f32 to vector<8x128xf32>
    %4 = arith.divf %3, %2 : vector<8x128xf32>
    %5 = math.exp %4 : vector<8x128xf32>
    %c0_2 = arith.constant 0 : index
    %c0_3 = arith.constant 0 : index
    %6 = vector.load %arg2[%c0_2, %c0_3] : memref<8x128xf32, #tpu.memory_space<vmem>>, vector<8x128xf32>
    tpu.vector_store %arg2[%c0_2, %c0_3], %5 {strides = array<i32>} : memref<8x128xf32, #tpu.memory_space<vmem>>, vector<8x128xf32>,
    return
  }
}

</mosaic_0001>

<bundles_post_ra>
// kernel: tpu_custom_call.1
= control target key start
LH: loop header
LB: loop body
LE: loop exit
PB: predicated region body
PF: predicated region fallthrough
CT: control target
= control target key end

     0   :  { %8 = vsyncpa [#allocation4], 0  ;;  %s147_s0 = inlined_call_operand.<no memory space> [shape: f32[1], index: 0, kind: input, shape index: {}]   ;;  %s148_s1 = inlined_call_operand.hbm [shape: f32[8,128], index: 1, kind: input, shape index: {}]   ;;  %s149_s2 = inlined_call_operand.hbm [shape: f32[8,128], index: 2, kind: output, shape index: {}]  }
   0x1   :  { %9 = vsyncpa [#allocation5], 0  ;;  %s103_s9 = smov [#allocation3]   ;;  %s55_s13 = scalar_lea.hbm %s148_s1, 128 }
   0x2   :  { %s18_s10 = sshll.u32 %s103_s9, 4  ;;  %p56_p0 = scmp.ne.s32.totalorder %s148_s1, %s55_s13  ;;  %s19_s10 = int_to_ptr.vmem [resolvable:$true] %s18_s10 }
   0x3   :  { %p59_p1 = scmp.lt.u32.totalorder %s55_s13, %s148_s1 }
   0x5   :  { %p61_p2 = pnand %p59_p1, %p56_p0 }
   0x7   :  { %64 = shalt.err (!%p61_p2)
}
   0x8   :  { %s65_s18 = scalar_lea.vmem %s19_s10, 128  ;;  %p70_p4 = scmp.lt.s32.totalorder %s19_s10, %s19_s10 }
   0x9   :  { %p66_p3 = scmp.ne.s32.totalorder %s19_s10, %s65_s18  ;;  %p71_p5 = scmp.lt.s32.totalorder %s65_s18, %s65_s18 }
   0xb   :  { %p72_p6 = por %p71_p5, %p70_p4 }
   0xd   :  { %p73_p7 = pnand %p72_p6, %p66_p3 }
   0xf   :  { %76 = shalt.err (!%p73_p7)
}
  0x10   :  { %21 = dma.hbm_to_vmem [thread:$0]  %s148_s1, 128, %s19_s10, [#allocation4]  }
  0x11   :  { %99 = dma.done.wait [#allocation4], 128  }
  0x12   :  { %100 = vsyncadd [#allocation4], 4294967168  ;;  %v27_v0 = vld [vmem:[#allocation3] sm:$0xff]  ;;  %s26_s23 = ssub.f32 0.0, %s147_s0  ;;  %s104_s24 = smov [#allocation6]  }
  0x13   :  { %51 = vrcp.f32 %v27_v0  ;;  %s40_s25 = sshll.u32 %s104_s24, 4  ;;  %s41_s25 = int_to_ptr.vmem [resolvable:$true] %s40_s25 }
  0x14   :  { %v28_v1 = vstv %s26_s23  ;;  %s77_s26 = scalar_lea.vmem %s41_s25, 128  ;;  %p82_p9 = scmp.lt.s32.totalorder %s41_s25, %s41_s25 }
  0x15   :  { %p78_p8 = scmp.ne.s32.totalorder %s41_s25, %s77_s26  ;;  %p83_p10 = scmp.lt.s32.totalorder %s77_s26, %s77_s26 }
  0x17   :  { %p84_p11 = por %p83_p10, %p82_p9 }
  0x19   :  { %p85_p12 = pnand %p84_p11, %p78_p8 }
  0x1d   :  { %v52_v2 = vpop.eup %51 }
  0x1e   :  { %v30_v3 = vmul.f32 %v52_v2, %v28_v1 }
  0x20   :  { %v31_v4 = vmul.f32 1.442695, %v30_v3 }
  0x22   :  { %53 = vpow2.f32 %v31_v4 }
  0x2c   :  { %v54_v5 = vpop.eup %53 }
  0x2d   :  { %33 = vst [vmem:[#allocation6] sm:$0xff] %v54_v5 }
  0x2e   :  { %88 = shalt.err (!%p85_p12)
}
  0x2f   :  { %s89_s0 = scalar_lea.hbm %s149_s2, 128 }
  0x30   :  { %p90_p13 = scmp.ne.s32.totalorder %s149_s2, %s89_s0  ;;  %p93_p0 = scmp.lt.u32.totalorder %s89_s0, %s149_s2 }
  0x32   :  { %p95_p1 = pnand %p93_p0, %p90_p13 }
  0x34   :  { %98 = shalt.err (!%p95_p1)
}
  0x35   :  { %43 = dma.vmem_to_hbm [thread:$0]  %s41_s25, 128, %s149_s2, [#allocation5]  }
  0x36   :  { %101 = dma.done.wait [#allocation5], 128  }
  0x37   :  { %102 = vsyncadd [#allocation5], 4294967168 }
  0x38   :  { %47 = vsyncpa [#allocation4], 1 }
  0x39   :  { %48 = vsyncpa [#allocation5], 1 }

</bundles_post_ra>
